<compile_context>
chip_gen: v7x
topology: tpu7x:2x2x1
jax: 0.10.0
libtpu: 0.0.40
codegen_flags: <defaults>
</compile_context>

<pallas_src>
import functools

import jax
import jax.numpy as jnp
from jax.experimental import pallas as pl
from jax.experimental.pallas import tpu as pltpu

ALPHA_RDROP = 4.0     # RDropLoss(alpha=4)
GAMMA = 2.0           # FocalLoss(gamma=2)
EPS = 1e-12           # clamp for log() in the focal / raw-probability path
NEG = -1e9            # "minus infinity" pad for rows that go through a softmax
LANES = 128           # TPU lane width; every slab row is padded to this
PROP_ALPHA = [0.759, 0.68, 0.9458, 0.9436, 0.9616, 0.915, 0.9618, 0.871,
              0.8724, 0.994, 0.986, 0.994, 0.9986, 0.993, 0.991, 0.9968,
              0.9986, 0.999, 0.9996]   # 19 classes, fixed by the module


# ---------------------------------------------------------------------------
# fused RDropLoss.forward kernel — one VMEM slab in, one SMEM scalar out.
#
# Slab row layout (all groups start at static offsets; B=8 keeps them
# sublane-aligned):
#   [0      , 2B)   CE logits, dropout pass 0   = [ans ; entity], NEG-padded
#   [2B     , 4B)   CE logits, dropout pass 1
#   [4B     , 6B)   CE one-hot labels           = [ans ; entity]
#   [6B     , 7B)   prop probabilities, pass 0  (0-padded)
#   [7B     , 8B)   prop probabilities, pass 1
#   [8B     , 9B)   prop multi-hot labels
#   [9B     ,10B)   efficiency (value in lane 0, rest 0)
#   [10B    ]       per-class focal alpha       (padded with 1.0)
#   [10B + 1]       raw loss_weight (3 values, rest NEG)
# ---------------------------------------------------------------------------
def rdrop_fused_kernel(slab_ref, out_ref, *, B, alpha, gamma, eps):
    inv_b = 1.0 / B
    half_alpha = 0.5 * alpha

    r_z, r_oh = 0, 4 * B
    r_p0, r_p1, r_y = 6 * B, 7 * B, 8 * B
    r_eff, r_pa, r_w = 9 * B, 10 * B, 10 * B + 1

    # ======================= merged CrossEntropy heads ======================
    # One softmax / log-softmax pass over (4B, 128): pass0 rows then pass1 rows.
    z = slab_ref[pl.ds(r_z, 4 * B), :]
    z = z - jnp.max(z, axis=-1, keepdims=True)
    e = jnp.exp(z)                                   # padded lanes -> exactly 0
    s = jnp.sum(e, axis=-1, keepdims=True)           # (4B, 1)
    ls = z - jnp.log(s)                              # log-softmax
    p = e / s                                        # exact softmax (review: no approx recip)

    ls0, ls1 = ls[:2 * B], ls[2 * B:]                # (2B, 128) each
    p0, p1 = p[:2 * B], p[2 * B:]

    onehot = slab_ref[pl.ds(r_oh, 2 * B), :]         # (2B, 128)
    # efficiency: only lane 0 is non-zero, so a lane-sum recovers it as (B, 1)
    # without any narrow-window load or transpose.
    eff = jnp.sum(slab_ref[pl.ds(r_eff, B), :], axis=-1, keepdims=True)

    # CE(reduction='none') of both dropout passes, per row; then the
    # efficiency-weighted batch mean:  ce.unsqueeze(0).mm(eff)/B == dot(ce,eff)/B
    ce01 = -jnp.sum(onehot * (ls0 + ls1), axis=-1, keepdims=True)     # (2B, 1)
    # symmetric KLDiv(batchmean), fused: 0.5/B * sum((p1-p0)*(ls1-ls0))
    klce = jnp.sum((p1 - p0) * (ls1 - ls0), axis=-1, keepdims=True)   # (2B, 1)

    loss1 = (jnp.sum(ce01[:B] * eff) + half_alpha * jnp.sum(klce[:B])) * inv_b   # ans head
    loss3 = (jnp.sum(ce01[B:] * eff) + half_alpha * jnp.sum(klce[B:])) * inv_b   # entity head

    # ==================== multi-label Focal head (prop) =====================
    pp0 = slab_ref[pl.ds(r_p0, B), :]
    pp1 = slab_ref[pl.ds(r_p1, B), :]
    y = slab_ref[pl.ds(r_y, B), :]
    av = slab_ref[pl.ds(r_pa, 1), :]                 # (1, 128), padded with 1.0

    sign = 2.0 * y - 1.0
    alpha_t = (y - (1.0 - av)) * sign                # alpha if y==1 else 1-alpha

    def focal(pr):
        pt = (y - (1.0 - pr)) * sign                 # p if y==1 else 1-p
        one_m = 1.0 - pt
        mod = one_m * one_m if gamma == 2.0 else one_m ** gamma   # static gamma=2: no pow
        # clamp before log (intentional defensive deviation from torch at p in {0,1})
        return -alpha_t * mod * jnp.log(jnp.maximum(pt, eps))

    fl01 = focal(pp0) + focal(pp1)                   # (B, 128); padded lanes contribute 0
    lp0 = jnp.log(jnp.maximum(pp0, eps))
    lp1 = jnp.log(jnp.maximum(pp1, eps))
    klf = (pp1 - pp0) * (lp1 - lp0)                  # padded lanes: 0 * finite = 0
    loss2 = (jnp.sum(fl01 * eff) + half_alpha * jnp.sum(klf)) * inv_b

    # ================ softmax(loss_weight) & weighted sum ===================
    wrow = slab_ref[pl.ds(r_w, 1), :]                # lanes 0..2 real, rest NEG
    wz = wrow - jnp.max(wrow, axis=-1, keepdims=True)
    we = jnp.exp(wz)                                 # padded lanes -> exactly 0
    w = we / jnp.sum(we, axis=-1, keepdims=True)     # (1, 128) softmax

    lane = jax.lax.broadcasted_iota(jnp.int32, (1, LANES), 1)
    loss_vec = (jnp.where(lane == 0, loss1, 0.0)
                + jnp.where(lane == 1, loss2, 0.0)
                + jnp.where(lane == 2, loss3, 0.0))
    out_ref[0] = jnp.sum(w * loss_vec)


# ---------------------------------------------------------------------------
# wrapper: build the single lane-dense slab and launch one pallas_call
# ---------------------------------------------------------------------------
def _pad_lanes(x, value):
    pad = LANES - x.shape[-1]
    if pad < 0:
        raise ValueError("class dimension wider than 128 lanes is not supported")
    if pad == 0:
        return x
    return jnp.pad(x, ((0, 0), (0, pad)), constant_values=value)


def rdrop_loss(ans_true, ans_pred, prop_true, prop_pred, entity_true,
               entity_pred, efficiency, loss_weight, prop_alpha=None,
               *, alpha=ALPHA_RDROP, gamma=GAMMA):
    """RDropLoss.forward — returns a shape (1,) float32 loss (same as torch)."""
    f32 = jnp.float32
    B = ans_pred[0].shape[0]
    if efficiency is None:
        efficiency = jnp.ones((B,), f32)
    if prop_alpha is None:                       # fixed list in the module -> baked in
        prop_alpha = jnp.asarray(PROP_ALPHA, f32)

    # Merged CE heads: [ans ; entity] rows, NEG-padded so padded classes carry
    # zero softmax mass even when C_ans != C_ent.
    z0 = jnp.concatenate([_pad_lanes(ans_pred[0].astype(f32), NEG),
                          _pad_lanes(entity_pred[0].astype(f32), NEG)], axis=0)
    z1 = jnp.concatenate([_pad_lanes(ans_pred[1].astype(f32), NEG),
                          _pad_lanes(entity_pred[1].astype(f32), NEG)], axis=0)
    labels = jnp.concatenate([ans_true.reshape(B).astype(jnp.int32),
                              entity_true.reshape(B).astype(jnp.int32)])
    onehot = jax.nn.one_hot(labels, LANES, dtype=f32)            # (2B, 128)

    slab = jnp.concatenate([
        z0, z1, onehot,                                          # 6B rows
        _pad_lanes(prop_pred[0].astype(f32), 0.0),               # B rows
        _pad_lanes(prop_pred[1].astype(f32), 0.0),               # B rows
        _pad_lanes(prop_true.astype(f32), 0.0),                  # B rows
        _pad_lanes(efficiency.astype(f32).reshape(B, 1), 0.0),   # B rows (lane 0)
        _pad_lanes(prop_alpha.astype(f32).reshape(1, -1), 1.0),  # 1 row
        _pad_lanes(loss_weight.astype(f32).reshape(1, -1), NEG), # 1 row (raw weights)
    ], axis=0)                                                   # (10B + 2, 128) f32

    kernel = functools.partial(rdrop_fused_kernel, B=B, alpha=float(alpha),
                               gamma=float(gamma), eps=EPS)
    slab_bytes = slab.size * 4
    return pl.pallas_call(
        kernel,
        out_shape=jax.ShapeDtypeStruct((1,), jnp.float32),
        in_specs=[pl.BlockSpec(memory_space=pltpu.MemorySpace.VMEM)],
        out_specs=pl.BlockSpec(memory_space=pltpu.MemorySpace.SMEM),
        cost_estimate=pl.CostEstimate(
            flops=int(40 * slab.size),                 # ~elementwise passes over the slab
            transcendentals=int(LANES * (8 * B + 2)),  # exp/log over logits + focal + weights
            bytes_accessed=int(slab_bytes + 4)),
    )(slab)


# ---------------------------------------------------------------------------
# pure-JAX reference (mirrors the PyTorch module) for a sanity check
# ---------------------------------------------------------------------------
def rdrop_loss_reference(ans_true, ans_pred, prop_true, prop_pred, entity_true,
                         entity_pred, efficiency, loss_weight, prop_alpha,
                         *, alpha=ALPHA_RDROP, gamma=GAMMA):
    B = ans_pred[0].shape[0]

    def ce_head(l0, l1, labels):
        ls0 = jax.nn.log_softmax(l0, axis=-1)
        ls1 = jax.nn.log_softmax(l1, axis=-1)
        p0, p1 = jnp.exp(ls0), jnp.exp(ls1)
        ce0 = -jnp.take_along_axis(ls0, labels[:, None], axis=-1)[:, 0]
        ce1 = -jnp.take_along_axis(ls1, labels[:, None], axis=-1)[:, 0]
        l_0 = jnp.dot(ce0, efficiency) / B
        l_1 = jnp.dot(ce1, efficiency) / B
        kl = 0.5 * (jnp.sum(p1 * (ls1 - ls0)) + jnp.sum(p0 * (ls0 - ls1))) / B
        return l_0 + l_1 + alpha * kl

    def focal_head(p0, p1, y):
        sign = 2.0 * y - 1.0
        alpha_t = (y - (1.0 - prop_alpha[None, :])) * sign

        def fl(p):
            pt = (y - (1.0 - p)) * sign
            loss = -alpha_t * (1.0 - pt) ** gamma * jnp.log(pt)
            return jnp.sum(loss * efficiency[:, None]) / B

        kl = 0.5 * (jnp.sum(p1 * (jnp.log(p1) - jnp.log(p0)))
                    + jnp.sum(p0 * (jnp.log(p0) - jnp.log(p1)))) / B
        return fl(p0) + fl(p1) + alpha * kl

    loss1 = ce_head(ans_pred[0], ans_pred[1], ans_true)
    loss2 = focal_head(prop_pred[0], prop_pred[1], prop_true)
    loss3 = ce_head(entity_pred[0], entity_pred[1], entity_true)
    w = jax.nn.softmax(loss_weight)
    return w[0] * loss1 + w[1] * loss2 + w[2] * loss3


if __name__ == "__main__":
    key = jax.random.PRNGKey(0)
    B, C_ANS, C_ENT = 8, 16, 11          # different widths exercise the NEG-padded merge
    C_PROP = len(PROP_ALPHA)             # 19

    keys = jax.random.split(key, 10)
    ans_pred = [jax.random.normal(keys[0], (B, C_ANS), jnp.float32),
                jax.random.normal(keys[1], (B, C_ANS), jnp.float32)]
    ans_true = jax.random.randint(keys[2], (B,), 0, C_ANS, jnp.int32)

    # prop predictions: per-class probabilities in (0, 1) (multi-label head)
    prop_pred = [jax.nn.sigmoid(jax.random.normal(keys[3], (B, C_PROP), jnp.float32)),
                 jax.nn.sigmoid(jax.random.normal(keys[4], (B, C_PROP), jnp.float32))]
    prop_true = jax.random.bernoulli(keys[5], 0.3, (B, C_PROP)).astype(jnp.float32)

    entity_pred = [jax.random.normal(keys[6], (B, C_ENT), jnp.float32),
                   jax.random.normal(keys[7], (B, C_ENT), jnp.float32)]
    entity_true = jax.random.randint(keys[8], (B,), 0, C_ENT, jnp.int32)

    efficiency = jax.random.uniform(keys[9], (B,), jnp.float32, 0.5, 1.0)

    # deterministic parameter init (matches nn.Parameter(torch.ones(3)))
    loss_weight = jnp.ones((3,), jnp.float32)
    prop_alpha = jnp.asarray(PROP_ALPHA, jnp.float32)

    loss_fn = jax.jit(rdrop_loss, static_argnames=("alpha", "gamma"))
    loss = loss_fn(ans_true, ans_pred, prop_true, prop_pred, entity_true,
                   entity_pred, efficiency, loss_weight)
    loss = jax.block_until_ready(loss)

    ref = rdrop_loss_reference(ans_true, ans_pred, prop_true, prop_pred,
                               entity_true, entity_pred, efficiency,
                               loss_weight, prop_alpha)
    ref = float(jax.block_until_ready(ref))

    assert loss.shape == (1,) and bool(jnp.isfinite(loss).all())
    # exact in-kernel softmax -> tolerance tightened 100x vs previous version
    assert abs(float(loss[0]) - ref) < 1e-4 * max(1.0, abs(ref)), (float(loss[0]), ref)
    print("KERNEL_OK")
</pallas_src>

<mosaic_0001>
module attributes {stable_mosaic.version = 11 : i64} {
  func.func @rdrop_fused_kernel(%arg0: memref<82x128xf32, #tpu.memory_space<vmem>>, %arg1: memref<1xf32, #tpu.memory_space<smem>>) attributes {dimension_semantics = [], scalar_prefetch = 0 : i64, scratch_operands = 0 : i64, tpu.core_type = #tpu.core_type<tc>} {
    %c0 = arith.constant 0 : index
    %c0_0 = arith.constant 0 : index
    %0 = vector.load %arg0[%c0, %c0_0] : memref<82x128xf32, #tpu.memory_space<vmem>>, vector<32x128xf32>
    %cst = arith.constant dense<0xFF800000> : vector<32xf32>
    %1 = vector.multi_reduction <maximumf>, %0, %cst [1] : vector<32x128xf32> to vector<32xf32>
    %2 = vector.shape_cast %1 : vector<32xf32> to vector<32x1xf32>
    %3 = vector.broadcast %2 : vector<32x1xf32> to vector<32x128xf32>
    %4 = arith.subf %0, %3 : vector<32x128xf32>
    %5 = math.exp %4 : vector<32x128xf32>
    %cst_1 = arith.constant dense<0.000000e+00> : vector<32xf32>
    %6 = vector.multi_reduction <add>, %5, %cst_1 [1] : vector<32x128xf32> to vector<32xf32>
    %7 = vector.shape_cast %6 : vector<32xf32> to vector<32x1xf32>
    %8 = math.log %7 : vector<32x1xf32>
    %9 = vector.broadcast %8 : vector<32x1xf32> to vector<32x128xf32>
    %10 = arith.subf %4, %9 : vector<32x128xf32>
    %11 = vector.broadcast %7 : vector<32x1xf32> to vector<32x128xf32>
    %12 = arith.divf %5, %11 : vector<32x128xf32>
    %13 = vector.extract_strided_slice %10 {offsets = [0, 0], sizes = [16, 128], strides = [1, 1]} : vector<32x128xf32> to vector<16x128xf32>
    %14 = vector.extract_strided_slice %10 {offsets = [16, 0], sizes = [16, 128], strides = [1, 1]} : vector<32x128xf32> to vector<16x128xf32>
    %15 = vector.extract_strided_slice %12 {offsets = [0, 0], sizes = [16, 128], strides = [1, 1]} : vector<32x128xf32> to vector<16x128xf32>
    %16 = vector.extract_strided_slice %12 {offsets = [16, 0], sizes = [16, 128], strides = [1, 1]} : vector<32x128xf32> to vector<16x128xf32>
    %c32 = arith.constant 32 : index
    %c0_2 = arith.constant 0 : index
    %17 = vector.load %arg0[%c32, %c0_2] : memref<82x128xf32, #tpu.memory_space<vmem>>, vector<16x128xf32>
    %c72 = arith.constant 72 : index
    %c0_3 = arith.constant 0 : index
    %18 = vector.load %arg0[%c72, %c0_3] : memref<82x128xf32, #tpu.memory_space<vmem>>, vector<8x128xf32>
    %cst_4 = arith.constant dense<0.000000e+00> : vector<8xf32>
    %19 = vector.multi_reduction <add>, %18, %cst_4 [1] : vector<8x128xf32> to vector<8xf32>
    %20 = vector.shape_cast %19 : vector<8xf32> to vector<8x1xf32>
    %21 = arith.addf %13, %14 : vector<16x128xf32>
    %22 = arith.mulf %17, %21 : vector<16x128xf32>
    %cst_5 = arith.constant dense<0.000000e+00> : vector<16xf32>
    %23 = vector.multi_reduction <add>, %22, %cst_5 [1] : vector<16x128xf32> to vector<16xf32>
    %24 = vector.shape_cast %23 : vector<16xf32> to vector<16x1xf32>
    %cst_6 = arith.constant 0.000000e+00 : f32
    %25 = vector.broadcast %cst_6 : f32 to vector<16x1xf32>
    %26 = arith.subf %25, %24 : vector<16x1xf32>
    %27 = arith.subf %16, %15 : vector<16x128xf32>
    %28 = arith.subf %14, %13 : vector<16x128xf32>
    %29 = arith.mulf %27, %28 : vector<16x128xf32>
    %cst_7 = arith.constant dense<0.000000e+00> : vector<16xf32>
    %30 = vector.multi_reduction <add>, %29, %cst_7 [1] : vector<16x128xf32> to vector<16xf32>
    %31 = vector.shape_cast %30 : vector<16xf32> to vector<16x1xf32>
    %32 = vector.extract_strided_slice %26 {offsets = [0, 0], sizes = [8, 1], strides = [1, 1]} : vector<16x1xf32> to vector<8x1xf32>
    %33 = arith.mulf %32, %20 : vector<8x1xf32>
    %34 = vector.shape_cast %33 : vector<8x1xf32> to vector<1x8x1xf32>
    %cst_8 = arith.constant dense<0.000000e+00> : vector<1xf32>
    %35 = vector.multi_reduction <add>, %34, %cst_8 [1, 2] : vector<1x8x1xf32> to vector<1xf32>
    %36 = vector.shape_cast %35 : vector<1xf32> to vector<1x1x1xf32>
    %37 = vector.extract %36[0, 0, 0] : f32 from vector<1x1x1xf32>
    %38 = vector.extract_strided_slice %31 {offsets = [0, 0], sizes = [8, 1], strides = [1, 1]} : vector<16x1xf32> to vector<8x1xf32>
    %39 = vector.shape_cast %38 : vector<8x1xf32> to vector<1x8x1xf32>
    %cst_9 = arith.constant dense<0.000000e+00> : vector<1xf32>
    %40 = vector.multi_reduction <add>, %39, %cst_9 [1, 2] : vector<1x8x1xf32> to vector<1xf32>
    %41 = vector.shape_cast %40 : vector<1xf32> to vector<1x1x1xf32>
    %42 = vector.extract %41[0, 0, 0] : f32 from vector<1x1x1xf32>
    %cst_10 = arith.constant 2.000000e+00 : f32
    %43 = arith.mulf %cst_10, %42 : f32
    %44 = arith.addf %37, %43 : f32
    %cst_11 = arith.constant 1.250000e-01 : f32
    %45 = arith.mulf %44, %cst_11 : f32
    %46 = vector.extract_strided_slice %26 {offsets = [8, 0], sizes = [8, 1], strides = [1, 1]} : vector<16x1xf32> to vector<8x1xf32>
    %47 = arith.mulf %46, %20 : vector<8x1xf32>
    %48 = vector.shape_cast %47 : vector<8x1xf32> to vector<1x8x1xf32>
    %cst_12 = arith.constant dense<0.000000e+00> : vector<1xf32>
    %49 = vector.multi_reduction <add>, %48, %cst_12 [1, 2] : vector<1x8x1xf32> to vector<1xf32>
    %50 = vector.shape_cast %49 : vector<1xf32> to vector<1x1x1xf32>
    %51 = vector.extract %50[0, 0, 0] : f32 from vector<1x1x1xf32>
    %52 = vector.extract_strided_slice %31 {offsets = [8, 0], sizes = [8, 1], strides = [1, 1]} : vector<16x1xf32> to vector<8x1xf32>
    %53 = vector.shape_cast %52 : vector<8x1xf32> to vector<1x8x1xf32>
    %cst_13 = arith.constant dense<0.000000e+00> : vector<1xf32>
    %54 = vector.multi_reduction <add>, %53, %cst_13 [1, 2] : vector<1x8x1xf32> to vector<1xf32>
    %55 = vector.shape_cast %54 : vector<1xf32> to vector<1x1x1xf32>
    %56 = vector.extract %55[0, 0, 0] : f32 from vector<1x1x1xf32>
    %cst_14 = arith.constant 2.000000e+00 : f32
    %57 = arith.mulf %cst_14, %56 : f32
    %58 = arith.addf %51, %57 : f32
    %cst_15 = arith.constant 1.250000e-01 : f32
    %59 = arith.mulf %58, %cst_15 : f32
    %c48 = arith.constant 48 : index
    %c0_16 = arith.constant 0 : index
    %60 = vector.load %arg0[%c48, %c0_16] : memref<82x128xf32, #tpu.memory_space<vmem>>, vector<8x128xf32>
    %c56 = arith.constant 56 : index
    %c0_17 = arith.constant 0 : index
    %61 = vector.load %arg0[%c56, %c0_17] : memref<82x128xf32, #tpu.memory_space<vmem>>, vector<8x128xf32>
    %c64 = arith.constant 64 : index
    %c0_18 = arith.constant 0 : index
    %62 = vector.load %arg0[%c64, %c0_18] : memref<82x128xf32, #tpu.memory_space<vmem>>, vector<8x128xf32>
    %c80 = arith.constant 80 : index
    %c0_19 = arith.constant 0 : index
    %63 = vector.load %arg0[%c80, %c0_19] : memref<82x128xf32, #tpu.memory_space<vmem>>, vector<1x128xf32>
    %cst_20 = arith.constant 2.000000e+00 : f32
    %64 = vector.broadcast %cst_20 : f32 to vector<8x128xf32>
    %65 = arith.mulf %64, %62 : vector<8x128xf32>
    %cst_21 = arith.constant 1.000000e+00 : f32
    %66 = vector.broadcast %cst_21 : f32 to vector<8x128xf32>
    %67 = arith.subf %65, %66 : vector<8x128xf32>
    %cst_22 = arith.constant 1.000000e+00 : f32
    %68 = vector.broadcast %cst_22 : f32 to vector<1x128xf32>
    %69 = arith.subf %68, %63 : vector<1x128xf32>
    %70 = vector.broadcast %69 : vector<1x128xf32> to vector<8x128xf32>
    %71 = arith.subf %62, %70 : vector<8x128xf32>
    %72 = arith.mulf %71, %67 : vector<8x128xf32>
    %cst_23 = arith.constant 1.000000e+00 : f32
    %73 = vector.broadcast %cst_23 : f32 to vector<8x128xf32>
    %74 = arith.subf %73, %60 : vector<8x128xf32>
    %75 = arith.subf %62, %74 : vector<8x128xf32>
    %76 = arith.mulf %75, %67 : vector<8x128xf32>
    %cst_24 = arith.constant 1.000000e+00 : f32
    %77 = vector.broadcast %cst_24 : f32 to vector<8x128xf32>
    %78 = arith.subf %77, %76 : vector<8x128xf32>
    %79 = arith.mulf %78, %78 : vector<8x128xf32>
    %cst_25 = arith.constant 0.000000e+00 : f32
    %80 = vector.broadcast %cst_25 : f32 to vector<8x128xf32>
    %81 = arith.subf %80, %72 : vector<8x128xf32>
    %82 = arith.mulf %81, %79 : vector<8x128xf32>
    %cst_26 = arith.constant 9.99999996E-13 : f32
    %83 = vector.broadcast %cst_26 : f32 to vector<8x128xf32>
    %84 = arith.maximumf %76, %83 : vector<8x128xf32>
    %85 = math.log %84 : vector<8x128xf32>
    %86 = arith.mulf %82, %85 : vector<8x128xf32>
    %cst_27 = arith.constant 1.000000e+00 : f32
    %87 = vector.broadcast %cst_27 : f32 to vector<8x128xf32>
    %88 = arith.subf %87, %61 : vector<8x128xf32>
    %89 = arith.subf %62, %88 : vector<8x128xf32>
    %90 = arith.mulf %89, %67 : vector<8x128xf32>
    %cst_28 = arith.constant 1.000000e+00 : f32
    %91 = vector.broadcast %cst_28 : f32 to vector<8x128xf32>
    %92 = arith.subf %91, %90 : vector<8x128xf32>
    %93 = arith.mulf %92, %92 : vector<8x128xf32>
    %cst_29 = arith.constant 0.000000e+00 : f32
    %94 = vector.broadcast %cst_29 : f32 to vector<8x128xf32>
    %95 = arith.subf %94, %72 : vector<8x128xf32>
    %96 = arith.mulf %95, %93 : vector<8x128xf32>
    %cst_30 = arith.constant 9.99999996E-13 : f32
    %97 = vector.broadcast %cst_30 : f32 to vector<8x128xf32>
    %98 = arith.maximumf %90, %97 : vector<8x128xf32>
    %99 = math.log %98 : vector<8x128xf32>
    %100 = arith.mulf %96, %99 : vector<8x128xf32>
    %101 = arith.addf %86, %100 : vector<8x128xf32>
    %cst_31 = arith.constant 9.99999996E-13 : f32
    %102 = vector.broadcast %cst_31 : f32 to vector<8x128xf32>
    %103 = arith.maximumf %60, %102 : vector<8x128xf32>
    %104 = math.log %103 : vector<8x128xf32>
    %cst_32 = arith.constant 9.99999996E-13 : f32
    %105 = vector.broadcast %cst_32 : f32 to vector<8x128xf32>
    %106 = arith.maximumf %61, %105 : vector<8x128xf32>
    %107 = math.log %106 : vector<8x128xf32>
    %108 = arith.subf %61, %60 : vector<8x128xf32>
    %109 = arith.subf %107, %104 : vector<8x128xf32>
    %110 = arith.mulf %108, %109 : vector<8x128xf32>
    %111 = vector.broadcast %20 : vector<8x1xf32> to vector<8x128xf32>
    %112 = arith.mulf %101, %111 : vector<8x128xf32>
    %113 = vector.shape_cast %112 : vector<8x128xf32> to vector<1x8x128xf32>
    %cst_33 = arith.constant dense<0.000000e+00> : vector<1xf32>
    %114 = vector.multi_reduction <add>, %113, %cst_33 [1, 2] : vector<1x8x128xf32> to vector<1xf32>
    %115 = vector.shape_cast %114 : vector<1xf32> to vector<1x1x1xf32>
    %116 = vector.extract %115[0, 0, 0] : f32 from vector<1x1x1xf32>
    %117 = vector.shape_cast %110 : vector<8x128xf32> to vector<1x8x128xf32>
    %cst_34 = arith.constant dense<0.000000e+00> : vector<1xf32>
    %118 = vector.multi_reduction <add>, %117, %cst_34 [1, 2] : vector<1x8x128xf32> to vector<1xf32>
    %119 = vector.shape_cast %118 : vector<1xf32> to vector<1x1x1xf32>
    %120 = vector.extract %119[0, 0, 0] : f32 from vector<1x1x1xf32>
    %cst_35 = arith.constant 2.000000e+00 : f32
    %121 = arith.mulf %cst_35, %120 : f32
    %122 = arith.addf %116, %121 : f32
    %cst_36 = arith.constant 1.250000e-01 : f32
    %123 = arith.mulf %122, %cst_36 : f32
    %c81 = arith.constant 81 : index
    %c0_37 = arith.constant 0 : index
    %124 = vector.load %arg0[%c81, %c0_37] : memref<82x128xf32, #tpu.memory_space<vmem>>, vector<1x128xf32>
    %cst_38 = arith.constant dense<0xFF800000> : vector<1xf32>
    %125 = vector.multi_reduction <maximumf>, %124, %cst_38 [1] : vector<1x128xf32> to vector<1xf32>
    %126 = vector.shape_cast %125 : vector<1xf32> to vector<1x1xf32>
    %127 = vector.broadcast %126 : vector<1x1xf32> to vector<1x128xf32>
    %128 = arith.subf %124, %127 : vector<1x128xf32>
    %129 = math.exp %128 : vector<1x128xf32>
    %cst_39 = arith.constant dense<0.000000e+00> : vector<1xf32>
    %130 = vector.multi_reduction <add>, %129, %cst_39 [1] : vector<1x128xf32> to vector<1xf32>
    %131 = vector.shape_cast %130 : vector<1xf32> to vector<1x1xf32>
    %132 = vector.broadcast %131 : vector<1x1xf32> to vector<1x128xf32>
    %133 = arith.divf %129, %132 : vector<1x128xf32>
    %134 = tpu.iota {dimensions = array<i32: 1>} : vector<1x128xi32>
    %c0_i32 = arith.constant 0 : i32
    %135 = vector.broadcast %c0_i32 : i32 to vector<1x128xi32>
    %136 = arith.cmpi eq, %134, %135 : vector<1x128xi32>
    %cst_40 = arith.constant 0.000000e+00 : f32
    %137 = vector.broadcast %45 : f32 to vector<1x128xf32>
    %138 = vector.broadcast %cst_40 : f32 to vector<1x128xf32>
    %139 = arith.select %136, %137, %138 : vector<1x128xi1>, vector<1x128xf32>
    %c1_i32 = arith.constant 1 : i32
    %140 = vector.broadcast %c1_i32 : i32 to vector<1x128xi32>
    %141 = arith.cmpi eq, %134, %140 : vector<1x128xi32>
    %cst_41 = arith.constant 0.000000e+00 : f32
    %142 = vector.broadcast %123 : f32 to vector<1x128xf32>
    %143 = vector.broadcast %cst_41 : f32 to vector<1x128xf32>
    %144 = arith.select %141, %142, %143 : vector<1x128xi1>, vector<1x128xf32>
    %145 = arith.addf %139, %144 : vector<1x128xf32>
    %c2_i32 = arith.constant 2 : i32
    %146 = vector.broadcast %c2_i32 : i32 to vector<1x128xi32>
    %147 = arith.cmpi eq, %134, %146 : vector<1x128xi32>
    %cst_42 = arith.constant 0.000000e+00 : f32
    %148 = vector.broadcast %59 : f32 to vector<1x128xf32>
    %149 = vector.broadcast %cst_42 : f32 to vector<1x128xf32>
    %150 = arith.select %147, %148, %149 : vector<1x128xi1>, vector<1x128xf32>
    %151 = arith.addf %145, %150 : vector<1x128xf32>
    %152 = arith.mulf %133, %151 : vector<1x128xf32>
    %153 = vector.shape_cast %152 : vector<1x128xf32> to vector<1x1x128xf32>
    %cst_43 = arith.constant dense<0.000000e+00> : vector<1xf32>
    %154 = vector.multi_reduction <add>, %153, %cst_43 [1, 2] : vector<1x1x128xf32> to vector<1xf32>
    %155 = vector.shape_cast %154 : vector<1xf32> to vector<1x1x1xf32>
    %156 = vector.extract %155[0, 0, 0] : f32 from vector<1x1x1xf32>
    %c0_44 = arith.constant 0 : index
    %157 = memref.load %arg1[%c0_44] : memref<1xf32, #tpu.memory_space<smem>>
    memref.store %156, %arg1[%c0_44] : memref<1xf32, #tpu.memory_space<smem>>
    return
  }
}

</mosaic_0001>

<bundles_post_ra>
// kernel: rdrop_loss.1
= control target key start
LH: loop header
LB: loop body
LE: loop exit
PB: predicated region body
PF: predicated region fallthrough
CT: control target
= control target key end

     0   :  { %s403_s0 = inlined_call_operand.vmem [shape: f32[82,128], index: 0, kind: input, shape index: {}]   ;;  %s404_s1 = inlined_call_operand.hbm [shape: f32[1], index: 1, kind: output, shape index: {}]  }
   0x1   :  { %v9_v0 = vld [vmem:[%s403_s0] sm:$0xff]  ;;  %v11_v1 = vld [vmem:[%s403_s0 + $0x10] sm:$0xff] }
   0x2   :  { %13 = vmax.xlane.f32.xlu0 %v9_v0  ;;  %17 = vmax.xlane.f32.xlu1 %v11_v1 }
   0x3   :  { %6 = vsyncpa [#allocation3], 0  ;;  %v10_v2 = vld [vmem:[%s403_s0 + $0x8] sm:$0xff]  ;;  %v12_v3 = vld [vmem:[%s403_s0 + $0x18] sm:$0xff]  ;;  %vm202_vm0 = vcmask 1040384   ;;  %vm87_vm1 = vcmask 7168  }
   0x4   :  { %v63_v20 = vld [vmem:[%s403_s0 + $0x48] sm:$0xff]  ;;  %v61_v38 = vld [vmem:[%s403_s0 + $0x20] sm:$0xff]  ;;  %v352_v57 = vld [vmem:[%s403_s0 + $0x51] sm:$0x1]  ;;  %s305_s18 = scalar_lea.hbm %s404_s1, 16 }
   0x5   :  { %v62_v45 = vld [vmem:[%s403_s0 + $0x28] sm:$0xff]  ;;  %v203_v58 = vsel %vm202_vm0, %v352_v57, -inf  ;;  %v359_v59 = vld [vmem:[%s403_s0 + $0x30] sm:$0xff]  ;;  %v137_v60 = vld [vmem:[%s403_s0 + $0x40] sm:$0xff]  ;;  %p306_p0 = scmp.ne.s32.totalorder %s404_s1, %s305_s18  ;;  %p309_p1 = scmp.lt.u32.totalorder %s305_s18, %s404_s1 }
   0x6   :  { %15 = vmax.xlane.f32.xlu0 %v10_v2  ;;  %19 = vmax.xlane.f32.xlu1 %v12_v3  ;;  %v367_v61 = vld [vmem:[%s403_s0 + $0x38] sm:$0xff]  ;;  %v139_v62 = vmul.f32 2.0, %v137_v60  ;;  %v148_v63 = vsub.f32 1.0, %v359_v59 }
   0x7   :  { %p311_p2 = pnand %p309_p1, %p306_p0 }
  0x8f   :  { %v14_v4 = vpop.xlane.xlu0 %13  ;;  %v18_v5 = vpop.xlane.xlu1 %17 }
  0x90   :  { %v21_v6 = vsub.f32 %v9_v0, %v14_v4  ;;  %v23_v7 = vsub.f32 %v11_v1, %v18_v5  ;;  %v159_v0 = vsub.f32 1.0, %v367_v61  ;;  %v142_v1 = vlaneseq }
  0x92   :  { %v25_v8 = vmul.f32 1.442695, %v21_v6  ;;  %v29_v9 = vmul.f32 1.442695, %v23_v7  ;;  %v160_v4 = vsub.f32 %v137_v60, %v159_v0  ;;  %v143_v5 = vshrl.u32 %v142_v1, 7 }
  0x93   :  { %v16_v10 = vpop.xlane.xlu0 %15  ;;  %v20_v11 = vpop.xlane.xlu1 %19 }
  0x94   :  { %269 = vpow2.f32 %v25_v8  ;;  %v22_v12 = vsub.f32 %v10_v2, %v16_v10  ;;  %v24_v13 = vsub.f32 %v12_v3, %v20_v11  ;;  %v253_v2 = vadd.f32 -1.0, %v139_v62 }
  0x95   :  { %271 = vpow2.f32 %v29_v9  ;;  %v149_v3 = vsub.f32 %v137_v60, %v148_v63  ;;  %v144_v10 = vsub.s32 0, %v143_v5 }
  0x96   :  { %v27_v14 = vmul.f32 1.442695, %v22_v12  ;;  %v31_v15 = vmul.f32 1.442695, %v24_v13  ;;  %v161_v8 = vmul.f32 %v253_v2, %v160_v4 }
  0x98   :  { %273 = vpow2.f32 %v27_v14  ;;  %v170_v14 = vmax.f32 %v359_v59, 1e-12 }
  0x99   :  { %275 = vpow2.f32 %v31_v15  ;;  %v173_v15 = vmax.f32 %v367_v61, 1e-12 }
  0x9e   :  { %v270_v16 = vpop.eup %269 }
  0x9f   :  { %33 = vadd.xlane.f32.xlu0 %v270_v16  ;;  %v272_v17 = vpop.eup %271 }
  0xa2   :  { %v274_v18 = vpop.eup %273 }
  0xa3   :  { %37 = vadd.xlane.f32.xlu0 %v272_v17  ;;  %35 = vadd.xlane.f32.xlu1 %v274_v18  ;;  %v276_v19 = vpop.eup %275 }
  0xa7   :  { %39 = vadd.xlane.f32.xlu1 %v276_v19  ;;  %64 = vadd.xlane.f32.xlu0 %v63_v20 }
 0x12c   :  { %v34_v21 = vpop.xlane.xlu0 %33 }
 0x12d   :  { %277 = vlog2.f32 %v34_v21 }
 0x130   :  { %v36_v22 = vpop.xlane.xlu1 %35  ;;  %v38_v23 = vpop.xlane.xlu0 %37 }
 0x131   :  { %279 = vlog2.f32 %v36_v22 }
 0x132   :  { %281 = vrcp.f32 %v36_v22 }
 0x133   :  { %283 = vlog2.f32 %v38_v23 }
 0x134   :  { %285 = vrcp.f32 %v38_v23  ;;  %v40_v24 = vpop.xlane.xlu1 %39  ;;  %v65_v20 = vpop.xlane.xlu0 %64 }
 0x135   :  { %287 = vlog2.f32 %v40_v24 }
 0x136   :  { %289 = vrcp.f32 %v40_v24 }
 0x137   :  { %v278_v25 = vpop.eup %277  ;;  %291 = vrcp.f32 %v34_v21 }
 0x138   :  { %v42_v28 = vmul.f32 0.6931472, %v278_v25 }
 0x13a   :  { %v49_v36 = vsub.f32 %v21_v6, %v42_v28  ;;  %v138_v6 = vld [vmem:[%s403_s0 + $0x50] sm:$0x1] }
 0x13b   :  { %v280_v26 = vpop.eup %279  ;;  %v141_v9 = vsub.f32 1.0, %v138_v6 }
 0x13c   :  { %v282_v27 = vpop.eup %281  ;;  %v44_v31 = vmul.f32 0.6931472, %v280_v26 }
 0x13d   :  { %v284_v29 = vpop.eup %283  ;;  %v56_v43 = vmul.f32 %v282_v27, %v274_v18 }
 0x13e   :  { %v286_v30 = vpop.eup %285  ;;  %v46_v32 = vmul.f32 0.6931472, %v284_v29  ;;  %v50_v41 = vsub.f32 %v22_v12, %v44_v31  ;;  %v165_v12 = vmax.f32 %v161_v8, 1e-12 }
 0x13f   :  { %v288_v33 = vpop.eup %287  ;;  %v58_v46 = vmul.f32 %v286_v30, %v272_v17 }
 0x140   :  { %v290_v34 = vpop.eup %289  ;;  %v48_v35 = vmul.f32 0.6931472, %v288_v33  ;;  %v51_v37 = vsub.f32 %v23_v7, %v46_v32  ;;  %v150_v7 = vmul.f32 %v253_v2, %v149_v3 }
 0x141   :  { %v60_v39 = vmul.f32 %v290_v34, %v276_v19  ;;  %v292_v44 = vpop.eup %291  ;;  %v162_v19 = vsub.f32 1.0, %v161_v8 }
 0x142   :  { %v66_v40 = vadd.f32 %v51_v37, %v49_v36  ;;  %v52_v42 = vsub.f32 %v24_v13, %v48_v35  ;;  %v54_v53 = vmul.f32 %v292_v44, %v270_v16  ;;  %v78_v54 = vsub.f32 %v51_v37, %v49_v36 }
 0x143   :  { %v77_v49 = vsub.f32 %v60_v39, %v56_v43  ;;  %v155_v11 = vmax.f32 %v150_v7, 1e-12  ;;  %v145_v13 = vrot.slane %v141_v9, %v144_v10  ;;  %v151_v18 = vsub.f32 1.0, %v150_v7 }
 0x144   :  { %v68_v47 = vmul.f32 %v66_v40, %v61_v38  ;;  %v67_v48 = vadd.f32 %v52_v42, %v50_v41  ;;  %v79_v50 = vsub.f32 %v52_v42, %v50_v41  ;;  %v76_v55 = vsub.f32 %v58_v46, %v54_v53 }
 0x145   :  { %293 = vlog2.f32 %v155_v11  ;;  %v146_v16 = vsub.f32 %v137_v60, %v145_v13  ;;  %v152_v22 = vmul.f32 %v151_v18, %v151_v18  ;;  %v163_v24 = vmul.f32 %v162_v19, %v162_v19 }
 0x146   :  { %70 = vadd.xlane.f32.xlu0 %v68_v47  ;;  %v69_v51 = vmul.f32 %v67_v48, %v62_v45  ;;  %v81_v52 = vmul.f32 %v79_v50, %v77_v49  ;;  %v80_v56 = vmul.f32 %v78_v54, %v76_v55  ;;  %295 = vlog2.f32 %v165_v12 }
 0x147   :  { %297 = vlog2.f32 %v170_v14  ;;  %v147_v17 = vmul.f32 %v253_v2, %v146_v16  ;;  %v176_v48 = vsub.f32 %v367_v61, %v359_v59 }
 0x148   :  { %72 = vadd.xlane.f32.xlu1 %v69_v51  ;;  %299 = vlog2.f32 %v173_v15 }
 0x149   :  { %v153_v23 = vsub.f32 0.0, %v147_v17 }
 0x14a   :  { %84 = vadd.xlane.f32.xlu0 %v81_v52 }
 0x14b   :  { %v154_v28 = vmul.f32 %v153_v23, %v152_v22  ;;  %v164_v30 = vmul.f32 %v163_v24, %v153_v23 }
 0x14c   :  { %82 = vadd.xlane.f32.xlu1 %v80_v56 }
 0x14f   :  { %v294_v21 = vpop.eup %293 }
 0x150   :  { %204 = vmax.xlane.f32.xlu1 %v203_v58  ;;  %v296_v25 = vpop.eup %295  ;;  %v157_v29 = vmul.f32 0.6931472, %v294_v21 }
 0x151   :  { %v298_v26 = vpop.eup %297  ;;  %v167_v31 = vmul.f32 0.6931472, %v296_v25 }
 0x152   :  { %v300_v32 = vpop.eup %299  ;;  %v158_v37 = vmul.f32 %v157_v29, %v154_v28  ;;  %v172_v39 = vmul.f32 0.6931472, %v298_v26 }
 0x153   :  { %v168_v38 = vmul.f32 %v167_v31, %v164_v30  ;;  %v175_v40 = vmul.f32 0.6931472, %v300_v32 }
 0x155   :  { %v169_v47 = vadd.f32 %v168_v38, %v158_v37  ;;  %v177_v49 = vsub.f32 %v175_v40, %v172_v39  ;;  %v215_v38 = vand.u32 127, %v142_v1 }
 0x157   :  { %v179_v53 = vmul.f32 %v169_v47, %v65_v20  ;;  %v178_v54 = vmul.f32 %v177_v49, %v176_v48  ;;  %vm216_vm2 = vcmp.eq.s32.totalorder %v215_v38, 0  ;;  %vm219_vm3 = vcmp.eq.s32.totalorder %v215_v38, 1 }
 0x158   :  { %vm223_vm4 = vcmp.eq.s32.totalorder %v215_v38, 2 }
 0x1d3   :  { %v71_v27 = vpop.xlane.xlu0 %70 }
 0x1d4   :  { %v74_v33 = vsub.f32 0.0, %v71_v27 }
 0x1d5   :  { %v73_v34 = vpop.xlane.xlu1 %72 }
 0x1d6   :  { %v75_v35 = vsub.f32 0.0, %v73_v34  ;;  %v86_v36 = vmul.f32 %v74_v33, %v65_v20 }
 0x1d7   :  { %v85_v46 = vpop.xlane.xlu0 %84 }
 0x1d8   :  { %v88_v41 = vsel %vm87_vm1, %v86_v36, 0.0  ;;  %v111_v42 = vmul.f32 %v75_v35, %v65_v20  ;;  %v122_v52 = vsel %vm87_vm1, %v85_v46, 0.0 }
 0x1d9   :  { %89 = vadd.xlane.f32.xlu0 %v88_v41  ;;  %v83_v43 = vpop.xlane.xlu1 %82 }
 0x1da   :  { %v98_v44 = vsel %vm87_vm1, %v83_v43, 0.0  ;;  %v112_v45 = vsel %vm87_vm1, %v111_v42, 0.0 }
 0x1db   :  { %99 = vadd.xlane.f32.xlu1 %v98_v44 }
 0x1dd   :  { %113 = vadd.xlane.f32.xlu0 %v112_v45  ;;  %v205_v50 = vpop.xlane.xlu1 %204 }
 0x1de   :  { %v206_v51 = vsub.f32 %v352_v57, %v205_v50 }
 0x1df   :  { %123 = vadd.xlane.f32.xlu1 %v122_v52 }
 0x1e0   :  { %v207_v55 = vmul.f32 1.442695, %v206_v51 }
 0x1e1   :  { %180 = vadd.xlane.f32.xlu0 %v179_v53 }
 0x1e2   :  { %301 = vpow2.f32 %v207_v55 }
 0x1e3   :  { %189 = vadd.xlane.f32.xlu1 %v178_v54 }
 0x1ec   :  { %v384_v56 = vpop.eup %301 }
 0x1ed   :  { %v209_v58 = vsel %vm202_vm0, %v384_v56, 0.0 }
 0x1ee   :  { %210 = vadd.xlane.f32.xlu0 %v209_v58 }
 0x266   :  { %v90_v59 = vpop.xlane.xlu0 %89 }
 0x267   :  { %v91_v60 = vrot.slane %v90_v59, 4 }
 0x268   :  { %v100_v61 = vpop.xlane.xlu1 %99 }
 0x269   :  { %v92_v62 = vadd.f32 %v91_v60, %v90_v59  ;;  %v101_v57 = vrot.slane %v100_v61, 4 }
 0x26a   :  { %v114_v63 = vpop.xlane.xlu0 %113 }
 0x26b   :  { %v93_v0 = vrot.slane %v92_v62, 2  ;;  %v102_v2 = vadd.f32 %v101_v57, %v100_v61  ;;  %v115_v3 = vrot.slane %v114_v63, 4 }
 0x26c   :  { %v124_v4 = vpop.xlane.xlu1 %123 }
 0x26d   :  { %v103_v5 = vrot.slane %v102_v2, 2  ;;  %v116_v6 = vadd.f32 %v115_v3, %v114_v63  ;;  %v125_v7 = vrot.slane %v124_v4, 4  ;;  %v94_v8 = vadd.f32 %v93_v0, %v92_v62 }
 0x26e   :  { %v181_v9 = vpop.xlane.xlu0 %180 }
 0x26f   :  { %v117_v10 = vrot.slane %v116_v6, 2  ;;  %v126_v11 = vadd.f32 %v125_v7, %v124_v4  ;;  %v182_v12 = vrot.slane %v181_v9, 4  ;;  %v95_v13 = vrot.slane %v94_v8, 1 }
 0x270   :  { %v190_v14 = vpop.xlane.xlu1 %189  ;;  %v104_v15 = vadd.f32 %v103_v5, %v102_v2 }
 0x271   :  { %v127_v16 = vrot.slane %v126_v11, 2  ;;  %v183_v17 = vadd.f32 %v182_v12, %v181_v9  ;;  %v191_v18 = vrot.slane %v190_v14, 4  ;;  %v96_v19 = vadd.f32 %v95_v13, %v94_v8 }
 0x272   :  { %v105_v20 = vrot.slane %v104_v15, 1  ;;  %v118_v21 = vadd.f32 %v117_v10, %v116_v6 }
 0x273   :  { %v184_v22 = vrot.slane %v183_v17, 2  ;;  %v192_v23 = vadd.f32 %v191_v18, %v190_v14  ;;  %254 = vpush %v96_v19  ;;  %v128_v24 = vadd.f32 %v127_v16, %v126_v11 }
 0x274   :  { %v106_v25 = vadd.f32 %v105_v20, %v104_v15  ;;  %v119_v26 = vrot.slane %v118_v21, 1 }
 0x275   :  { %v193_v27 = vrot.slane %v192_v23, 2  ;;  %v129_v28 = vrot.slane %v128_v24, 1  ;;  %v185_v29 = vadd.f32 %v184_v22, %v183_v17 }
 0x276   :  { %256 = vpush %v106_v25  ;;  %v120_v30 = vadd.f32 %v119_v26, %v118_v21 }
 0x277   :  { %v130_v31 = vadd.f32 %v129_v28, %v128_v24  ;;  %v186_v32 = vrot.slane %v185_v29, 1  ;;  %v194_v33 = vadd.f32 %v193_v27, %v192_v23 }
 0x278   :  { %258 = vpush %v120_v30 }
 0x279   :  { %260 = vpush %v130_v31  ;;  %v187_v34 = vadd.f32 %v186_v32, %v185_v29  ;;  %v195_v35 = vrot.slane %v194_v33, 1 }
 0x27b   :  { %262 = vpush %v187_v34  ;;  %v196_v36 = vadd.f32 %v195_v35, %v194_v33  ;;  %v211_v37 = vpop.xlane.xlu0 %210 }
 0x27c   :  { %303 = vrcp.f32 %v211_v37 }
 0x27d   :  { %264 = vpush %v196_v36 }
 0x286   :  { %v304_v42 = vpop.eup %303 }
 0x287   :  { %v213_v47 = vmul.f32 %v304_v42, %v384_v56 }
 0x2a4   :  { %s255_s0 = spop %254 }
 0x2a7   :  { %s257_s30 = spop %256 }
 0x2a8   :  { %s108_s2 = smul.f32 2.0, %s257_s30 }
 0x2a9   :  { %s259_s3 = spop %258 }
 0x2aa   :  { %s261_s4 = spop %260  ;;  %s109_s5 = sadd.f32 %s255_s0, %s108_s2 }
 0x2ab   :  { %s132_s6 = smul.f32 2.0, %s261_s4 }
 0x2ac   :  { %s263_s7 = spop %262  ;;  %s110_s10 = smul.f32 0.125, %s109_s5 }
 0x2ad   :  { %s133_s8 = sadd.f32 %s259_s3, %s132_s6 }
 0x2ae   :  { %s265_s9 = spop %264  ;;  %v217_v39 = vstv %s110_s10 }
 0x2af   :  { %s198_s11 = smul.f32 2.0, %s265_s9  ;;  %v218_v43 = vsel %vm216_vm2, %v217_v39, 0.0 }
 0x2b0   :  { %s134_s12 = smul.f32 0.125, %s133_s8 }
 0x2b1   :  { %s199_s13 = sadd.f32 %s263_s7, %s198_s11 }
 0x2b2   :  { %v224_v40 = vstv %s134_s12 }
 0x2b3   :  { %s200_s14 = smul.f32 0.125, %s199_s13  ;;  %v225_v46 = vsel %vm223_vm4, %v224_v40, 0.0 }
 0x2b5   :  { %v220_v41 = vstv %s200_s14 }
 0x2b6   :  { %v221_v44 = vsel %vm219_vm3, %v220_v41, 0.0 }
 0x2b7   :  { %v222_v45 = vadd.f32 %v221_v44, %v218_v43 }
 0x2b9   :  { %v226_v48 = vadd.f32 %v225_v46, %v222_v45 }
 0x2bb   :  { %v227_v49 = vmul.f32 %v226_v48, %v213_v47 }
 0x2bd   :  { %v228_v1 = vsel %vm202_vm0, %v227_v49, 0.0 }
 0x2be   :  { %229 = vadd.xlane.f32.xlu1 %v228_v1 }
 0x34b   :  { %v230_v50 = vpop.xlane.xlu1 %229 }
 0x34c   :  { %v231_v51 = vrot.slane %v230_v50, 4 }
 0x34e   :  { %v232_v52 = vadd.f32 %v231_v51, %v230_v50 }
 0x350   :  { %v233_v53 = vrot.slane %v232_v52, 2 }
 0x352   :  { %v234_v54 = vadd.f32 %v233_v53, %v232_v52 }
 0x354   :  { %v235_v55 = vrot.slane %v234_v54, 1 }
 0x356   :  { %v236_v58 = vadd.f32 %v235_v55, %v234_v54 }
 0x358   :  { %266 = vpush %v236_v58 }
 0x389   :  { %s267_s15 = spop %266 }
 0x38a   :  { %239 = sst [smem:[#allocation2]] %s267_s15 }
 0x38b   :  { %314 = shalt.err (!%p311_p2)
}
 0x38c   :  { %s317_s23 = smov [#allocation2]  }
 0x38d   :  { %247 = dma.smem_to_hbm %s317_s23, 16, %s404_s1, [#allocation3]  }
 0x38e   :  { %315 = dma.done.wait [#allocation3], 16  }
 0x38f   :  { %316 = vsyncadd [#allocation3], 4294967280 }
 0x390   :  { %251 = sfence }
 0x391   :  { %252 = vsyncpa [#allocation3], 1 }

</bundles_post_ra>
